<compile_context>
chip_gen: v7x
topology: tpu7x:2x2x1
jax: 0.10.0
libtpu: 0.0.40
codegen_flags: <defaults>
</compile_context>

<pallas_src>
import jax
import jax.numpy as jnp
from jax.experimental import pallas as pl
from jax.experimental.pallas import tpu as pltpu


# ---------------------------------------------------------------------------
# Pallas kernel (only used when a materialized copy is explicitly requested).
# ---------------------------------------------------------------------------
def _identity_copy_kernel(x_ref, o_ref):
    # Pure pass-through: one VMEM tile in, same tile out.
    o_ref[...] = x_ref[...]


def _round_up(x, m):
    return ((x + m - 1) // m) * m


def _tile_plan(batch, feat, itemsize, budget_bytes=8 * 1024 * 1024):
    """Pick (batch_tile, feat_tile) for a mem-bound copy.

    - feat tile is lane-dense (multiple of 128) unless F itself is not a
      multiple of 128, in which case the full extent is used (always legal).
    - batch tile is a multiple of the dtype's sublane packing.
    - block size targets ~budget_bytes so 4 live double-buffers stay well
      inside the explicit vmem limit on all generations.
    - prefer >=2 steps along the parallel batch axis (v7x dual-core DMA).
    """
    sub = max(8, 32 // max(1, itemsize))  # 8 for f32, 16 for bf16, 32 for i8
    lane = 128

    if feat % lane == 0:
        tf = (budget_bytes // (sub * itemsize)) // lane * lane
        tf = int(min(feat, max(lane, tf)))
    else:
        tf = feat  # full-extent last dim is always legal

    tb = (budget_bytes // max(1, tf * itemsize)) // sub * sub
    tb = int(max(tb, sub))
    if tb >= batch:
        tb = batch  # full-extent block is always legal

    # Guarantee at least 2 grid steps when the whole array would otherwise be
    # a single block, so the "parallel" axis can actually be split across the
    # two TensorCores on v7x.
    if tb == batch and tf == feat and batch >= 2 * sub:
        tb = min(batch, _round_up(pl.cdiv(batch, 2), sub))

    return tb, tf


def _materialized_copy(inputs):
    """Improved Pallas identity copy (only when a fresh buffer is required)."""
    B, F = inputs.shape
    itemsize = inputs.dtype.itemsize
    tb, tf = _tile_plan(B, F, itemsize)
    grid = (pl.cdiv(B, tb), pl.cdiv(F, tf))

    return pl.pallas_call(
        _identity_copy_kernel,
        out_shape=jax.ShapeDtypeStruct((B, F), inputs.dtype),
        grid=grid,
        in_specs=[pl.BlockSpec((tb, tf), lambda i, j: (i, j))],
        out_specs=pl.BlockSpec((tb, tf), lambda i, j: (i, j)),
        compiler_params=pltpu.CompilerParams(
            dimension_semantics=("parallel", "parallel"),
            vmem_limit_bytes=48 * 1024 * 1024,
        ),
        cost_estimate=pl.CostEstimate(
            flops=0,
            transcendentals=0,
            bytes_accessed=2 * B * F * itemsize,
        ),
    )(inputs)


# ---------------------------------------------------------------------------
# Forward wrapper (matches StraightForwardZ.forward).
# ---------------------------------------------------------------------------
def straightforward_z_forward(inputs, *, split, embedding_dim, materialize=False):
    """StraightForwardZ.forward.

    Args:
      inputs: (B, split * embedding_dim) array ("pooled_memory").
      materialize: if True, produce `quantized` as a fresh physical copy via
        the Pallas kernel; otherwise (default, fastest) pass the input through
        untouched — the op is a semantic no-op.

    Returns:
      dict with 'quantized', 'quantized_stack', 'encoding_indices'.
    """
    B, F = inputs.shape
    assert F == split * embedding_dim, "memory size unmatched"

    if materialize:
        quantized = _materialized_copy(inputs)
    else:
        # Fastest path: no kernel, no HBM traffic — identity is identity.
        quantized = inputs

    # Zero-cost metadata reshape at the XLA level.
    quantized_stack = quantized.reshape(B, split, embedding_dim)
    # torch.zeros(B) default dtype is float32; constant-folded by XLA.
    encoding_indices = jnp.zeros((B,), jnp.float32)

    return {
        "quantized": quantized,
        "quantized_stack": quantized_stack,
        "encoding_indices": encoding_indices,
    }


# TODO(synk): quantize_embedding raises NotImplementedError in the reference
# module, so no kernel is provided for it.


if __name__ == "__main__":
    B = 16
    split = 4            # config.decompose_number
    embedding_dim = 32   # F = 128 -> lane-dense

    key = jax.random.PRNGKey(0)
    x = jax.random.normal(key, (B, split * embedding_dim), dtype=jnp.float32)

    # Default (recommended) path: no kernel at all.
    out = straightforward_z_forward(x, split=split, embedding_dim=embedding_dim)
    # Optional materialized path: exercises the improved Pallas copy kernel.
    out_mat = straightforward_z_forward(
        x, split=split, embedding_dim=embedding_dim, materialize=True
    )
    jax.block_until_ready((out, out_mat))

    ref_stack = x.reshape(B, split, embedding_dim)
    zeros_ref = jnp.zeros((B,), jnp.float32)

    for o in (out, out_mat):
        assert o["quantized"].shape == (B, split * embedding_dim)
        assert o["quantized_stack"].shape == (B, split, embedding_dim)
        assert o["encoding_indices"].shape == (B,)
        assert o["encoding_indices"].dtype == jnp.float32
        assert jnp.array_equal(o["quantized"], x)
        assert jnp.array_equal(o["quantized_stack"], ref_stack)
        assert jnp.array_equal(o["encoding_indices"], zeros_ref)

    print("KERNEL_OK")
</pallas_src>

<mosaic_0001>
module attributes {stable_mosaic.version = 11 : i64} {
  func.func @_identity_copy_kernel(%arg0: i32, %arg1: i32, %arg2: memref<8x128xf32, #tpu.memory_space<vmem>>, %arg3: memref<8x128xf32, #tpu.memory_space<vmem>>) attributes {dimension_semantics = [#tpu.dimension_semantics<parallel>, #tpu.dimension_semantics<parallel>], iteration_bounds = array<i64: 2, 1>, scalar_prefetch = 0 : i64, scratch_operands = 0 : i64, tpu.core_type = #tpu.core_type<tc>, window_params = [{transform_indices = @transform_0, window_bounds = array<i64: 8, 128>}, {transform_indices = @transform_1, window_bounds = array<i64: 8, 128>}]} {
    %c0 = arith.constant 0 : index
    %c0_0 = arith.constant 0 : index
    %0 = vector.load %arg2[%c0, %c0_0] : memref<8x128xf32, #tpu.memory_space<vmem>>, vector<8x128xf32>
    %c0_1 = arith.constant 0 : index
    %c0_2 = arith.constant 0 : index
    %1 = vector.load %arg3[%c0_1, %c0_2] : memref<8x128xf32, #tpu.memory_space<vmem>>, vector<8x128xf32>
    tpu.vector_store %arg3[%c0_1, %c0_2], %0 {strides = array<i32>} : memref<8x128xf32, #tpu.memory_space<vmem>>, vector<8x128xf32>,
    return
  }
  func.func @transform_0(%arg0: i32, %arg1: i32) -> (i32, i32) {
    %c0_i32 = arith.constant 0 : i32
    return %arg0, %arg1 : i32, i32
  }
  func.func @transform_1(%arg0: i32, %arg1: i32) -> (i32, i32) {
    %c0_i32 = arith.constant 0 : i32
    return %arg0, %arg1 : i32, i32
  }
}

</mosaic_0001>

<bundles_post_ra>
// kernel: tpu_custom_call.1
= control target key start
LH: loop header
LB: loop body
LE: loop exit
PB: predicated region body
PF: predicated region fallthrough
CT: control target
= control target key end

     0   :  { %6 = vsyncpa [#allocation3], 0  ;;  %s619_s0 = inlined_call_operand.hbm [shape: f32[16,128], index: 0, kind: input, shape index: {}]   ;;  %s620_s1 = inlined_call_operand.hbm [shape: f32[16,128], index: 1, kind: output, shape index: {}]  }
   0x1   :  { %8 = vsyncpa [#allocation3 + $0x1], 0 }
   0x2   :  { %9 = vsyncpa [#allocation4], 0 }
   0x3   :  { %11 = vsyncpa [#allocation4 + $0x1], 0  ;;  %s447_s6 = smov 0   ;;  %s449_s7 = smov 0  }
   0x4   :  { %s451_s8 = smov 0   ;;  %s453_s9 = smov 0  }
   0x5   :  { %s455_s10 = smov 0   ;;  %s457_s11 = smov 0  }
   0x6 LB: > { %s246_s12 = sadd.s32 4294967295, %s433_s11   ;;  %s247_s13 = sadd.s32 4294967294, %s433_s11   ;;  %s433_s11 = sphi %s457_s11, %s17_s11   ;;  %s429_s10 = sphi %s455_s10, %s636_s10   ;;  %s425_s9 = sphi %s453_s9, %s635_s9   ;;  %s421_s8 = sphi %s451_s8, %s634_s8   ;;  %s417_s7 = sphi %s449_s7, %s633_s7   ;;  %s413_s6 = sphi %s447_s6, %s632_s6  }
   0x7   : > { %s29_s14 = sadd.s32 1, %s429_s10  ;;  %s38_s15 = sadd.s32 1, %s421_s8 }
   0x8   : > { %p31_p0 = scmp.ge.s32.totalorder %s29_s14, 2  ;;  %p45_p1 = scmp.ne.s32.totalorder %s421_s8, %s417_s7 }
   0x9   : > { %p46_p2 = scmp.eq.s32.totalorder %s433_s11, 0  ;;  %p51_p3 = scmp.ne.s32.totalorder %s417_s7, %s413_s6 }
   0xa   : > { %s638_s14 = smov (%p31_p0, %s29_s14), 0  ;;  %p52_p5 = scmp.eq.s32.totalorder %s246_s12, 0 }
   0xb   : > { %p488_p4 = por %p46_p2, %p45_p1  ;;  %s33_s17 = ssub.s32 %s429_s10, %s638_s14 }
   0xc   : > { %p77_p6 = scmp.eq.s32.totalorder %s246_s12, 1  ;;  %p36_p7 = scmp.eq.s32.totalorder %s33_s17, 0 }
   0xd   : > { %p494_p8 = por %p52_p5, %p51_p3  ;;  %p83_p10 = scmp.eq.s32.totalorder %s247_s13, 1 }
   0xe   : > { %p498_p9 = por %p77_p6, %p45_p1  ;;  %p271_p13 = scmp.lt.s32.totalorder %s433_s11, 2 }
   0xf   : > { %s503_s20 = scalar_select %p36_p7, %s421_s8, %s38_s15  }
  0x10   : > { %s624_s19 = scalar_select %p498_p9, 1, 0 }
  0x11   : > { %p505_p11 = por %p83_p10, %p51_p3  ;;  %s103_s22 = sand.u32 1, %s421_s8  }
  0x12   : > { %s250_s23 = sshll.u32 %s103_s22, 3  ;;  %s251_s24 = sshll.u32 %s429_s10, 7 }
  0x13   : > { %s625_s21 = scalar_select %p505_p11, 1, 0 }
  0x14   : > { %s516_s27 = scalar_lea.hbm %s619_s0, %s251_s24  ;;  %s107_s28 = scalar_lea.vmem [#allocation2], %s250_s23 }
  0x15   : > { %s115_s29 = sshll.u32 %s107_s28, 4  ;;  %p522_p0 = pnand %p271_p13, %p488_p4  ;;  %s518_s29 = int_to_ptr.vmem [resolvable:$true] %s115_s29 }
  0x16   : > { %s104_s2 = scalar_lea.sflag [#allocation3], %s103_s22  ;;  %s321_s3 = scalar_lea.hbm %s516_s27, 128 }
  0x17   : > { %p322_p3 = scmp.ne.s32.totalorder %s516_s27, %s321_s3  ;;  %p323_p5 = pneg %p522_p0 }
  0x18   : > { %s326_s12 = scalar_lea.hbm %s619_s0, 256  ;;  %p327_p4 = scmp.lt.u32.totalorder %s516_s27, %s619_s0 }
  0x19   : > { %p324_p6 = pnand %p323_p5, %p322_p3  ;;  %p328_p10 = scmp.lt.u32.totalorder %s326_s12, %s321_s3 }
  0x1a   : > { %p330_p12 = scmp.lt.u32.totalorder %s321_s3, %s516_s27 }
  0x1b   : > { %p325_p7 = pneg %p324_p6  ;;  %p329_p13 = por %p328_p10, %p327_p4 }
  0x1d   : > { %p331_p1 = por %p330_p12, %p329_p13 }
  0x1f   : > { %p332_p2 = pnand %p331_p1, %p325_p7 }
  0x21   : > { %335 = shalt.err (!%p332_p2)
}
  0x22   : > { %s336_s16 = scalar_lea.vmem %s518_s29, 128  ;;  %s435_s17 = smov [#allocation2]  }
  0x23   : > { %p337_p3 = scmp.ne.s32.totalorder %s518_s29, %s336_s16  ;;  %s341_s22 = sshll.u32 %s435_s17, 4  ;;  %s342_s22 = int_to_ptr.vmem [resolvable:$false] %s341_s22 }
  0x24   : > { %s343_s23 = scalar_lea.vmem %s342_s22, 256  ;;  %p344_p9 = scmp.lt.s32.totalorder %s518_s29, %s342_s22 }
  0x25   : > { %p339_p6 = pnand %p337_p3, %p323_p5  ;;  %p345_p4 = scmp.lt.s32.totalorder %s343_s23, %s336_s16 }
  0x27   : > { %p340_p11 = pneg %p339_p6  ;;  %p346_p10 = por %p345_p4, %p344_p9 }
  0x29   : > { %p347_p12 = pnand %p346_p10, %p340_p11 }
  0x2b   : > { %350 = shalt.err (!%p347_p12)
}
  0x2c   : > { %266 = dma.hbm_to_vmem [thread:$0]  (!%p522_p0), %s516_s27, 128, %s518_s29, %s104_s2  }
  0x2d   : > { %p627_p1 = scmp.lt.s32.totalorder %s433_s11, 3  ;;  %p628_p2 = scmp.ge.s32.totalorder %s433_s11, 1 }
  0x2f   : > { %p121_p5 = pnand %p628_p2, %p627_p1 }
  0x30   : > { %s558_s24 = sand.u32 (!%p121_p5), 1, %s417_s7  }
  0x31   : > { %124 = sbr.rel (%p121_p5) target bundleno = 83 (0x53), region = 24  ;;  %s253_s25 = sshll.u32 (!%p121_p5), %s558_s24, 3 }
  0x32   : > { %s127_s26 = scalar_lea.sflag (!%p121_p5), [#allocation3], %s558_s24  ;;  %s130_s28 = scalar_lea.vmem (!%p121_p5), [#allocation2], %s253_s25 }
  0x38   : > { %404 = dma.done.wait (%p494_p8), %s127_s26, 128  }
  0x39   : > { %406 = vsyncadd (%p494_p8), %s127_s26, 4294967168  ;;  %s148_s27 = scalar_lea.vmem [#allocation5], %s253_s25  ;;  %s256_s30 = sshll.u32 %s425_s9, 7  ;;  %v149_v0 = vld [vmem:[%s130_s28] sm:$0xff] }
  0x3a   : > { %s166_s29 = sshll.u32 %s148_s27, 4  ;;  %s572_s4 = scalar_lea.hbm %s620_s1, %s256_s30  ;;  %150 = vst [vmem:[%s148_s27] sm:$0xff] %v149_v0  ;;  %s567_s29 = int_to_ptr.vmem [resolvable:$true] %s166_s29 }
  0x3b   : > { %s152_s18 = scalar_lea.sflag [#allocation4], %s558_s24  ;;  %s351_s5 = scalar_lea.vmem %s567_s29, 128 }
  0x3c   : > { %p352_p8 = scmp.ne.s32.totalorder %s567_s29, %s351_s5  ;;  %p629_p9 = scmp.ne.s32.totalorder %s624_s19, 0 }
  0x3d   : > { %s436_s12 = smov [#allocation5]  }
  0x3e   : > { %p353_p11 = pnand %p352_p8, %p629_p9  ;;  %s355_s9 = sshll.u32 %s436_s12, 4  ;;  %s356_s9 = int_to_ptr.vmem [resolvable:$false] %s355_s9 }
  0x3f   : > { %s357_s13 = scalar_lea.vmem %s356_s9, 256  ;;  %p358_p7 = scmp.lt.s32.totalorder %s567_s29, %s356_s9 }
  0x40   : > { %p354_p0 = pneg %p353_p11  ;;  %p359_p13 = scmp.lt.s32.totalorder %s357_s13, %s351_s5 }
  0x42   : > { %p360_p3 = por %p359_p13, %p358_p7 }
  0x44   : > { %p361_p6 = pnand %p360_p3, %p354_p0 }
  0x46   : > { %364 = shalt.err (!%p361_p6)
}
  0x47   : > { %s365_s15 = scalar_lea.hbm %s572_s4, 128  ;;  %s369_s22 = scalar_lea.hbm %s620_s1, 256 }
  0x48   : > { %p366_p4 = scmp.ne.s32.totalorder %s572_s4, %s365_s15  ;;  %p370_p1 = scmp.lt.u32.totalorder %s572_s4, %s620_s1 }
  0x49   : > { %p371_p2 = scmp.lt.u32.totalorder %s369_s22, %s365_s15  ;;  %p373_p8 = scmp.lt.u32.totalorder %s365_s15, %s572_s4 }
  0x4a   : > { %p367_p10 = pnand %p366_p4, %p629_p9 }
  0x4b   : > { %p372_p5 = por %p371_p2, %p370_p1 }
  0x4c   : > { %p368_p12 = pneg %p367_p10 }
  0x4d   : > { %p374_p11 = por %p373_p8, %p372_p5 }
  0x4f   : > { %p375_p0 = pnand %p374_p11, %p368_p12 }
  0x51   : > { %378 = shalt.err (!%p375_p0)
}
  0x52   : > { %261 = dma.vmem_to_hbm [thread:$0]  (%p629_p9), %s567_s29, 128, %s572_s4, %s152_s18  }
  0x53 PF: > { %s178_s25 = sand.u32 1, %s413_s6   ;;  %p630_p7 = scmp.ne.s32.totalorder %s625_s21, 0 }
  0x54   : > { %p631_p13 = scmp.ge.s32.totalorder %s433_s11, 2  ;;  %s179_s26 = scalar_lea.sflag [#allocation4], %s178_s25 }
  0x56   : > { %p268_p3 = pnand %p631_p13, %p630_p7 }
  0x58   : > { %408 = dma.done.wait (!%p268_p3), %s179_s26, 128  }
  0x59   : > { %410 = vsyncadd (!%p268_p3), %s179_s26, 4294967168  ;;  %s17_s11 = sadd.s32 1, %s433_s11   ;;  %s632_s6 = smov %s417_s7 }
  0x5a   : > { %p14_p6 = scmp.ge.s32.totalorder %s17_s11, 4   ;;  %s633_s7 = smov %s421_s8 }
  0x5b   : > { %s634_s8 = smov %s503_s20  ;;  %s635_s9 = smov %s429_s10 }
  0x5c   : > { %s636_s10 = smov %s638_s14  ;;  %16 = sbr.rel (!%p14_p6) target bundleno = 6 (0x6), region = 69 }
  0x63   :  { %184 = vsyncpa [#allocation3], 1 }
  0x64   :  { %186 = vsyncpa [#allocation3 + $0x1], 1 }
  0x65   :  { %187 = vsyncpa [#allocation4], 1 }
  0x66   :  { %189 = vsyncpa [#allocation4 + $0x1], 1 }

</bundles_post_ra>
